<compile_context>
chip_gen: v7x
topology: tpu7x:2x2x1
jax: 0.10.0
libtpu: 0.0.40
codegen_flags: <defaults>
</compile_context>

<pallas_src>
import functools

import jax
import jax.numpy as jnp
from jax.experimental import pallas as pl
from jax.experimental.pallas import tpu as pltpu


def _neural_module_kernel(x_ref, w_ref, b_ref, g_ref, o_ref, *,
                          n_hidden, mxu_group_sum, bf16_exp):
    """One token tile of the fused Linear + grouped softmax.

    x_ref: (tm, P*D)        packed token embeddings (P tokens side by side)
    w_ref: (P*D, P*H*H)     block-diagonal weight (1/temperature folded in), resident
    b_ref: (1,   P*H*H)     tiled bias (scaled by 1/temperature), resident
    g_ref: (P*H*H, P*H*H)   block-diagonal ones -> per-group sum on the MXU, resident
    o_ref: (tm, P*H*H)      softmax probabilities, lane-dense output
    """
    wl = o_ref.shape[-1]

    # Linear on the MXU (temperature already folded into w/b in the wrapper).
    logits = jnp.dot(x_ref[...], w_ref[...],
                     preferred_element_type=jnp.float32) + b_ref[...]

    pow2 = (n_hidden & (n_hidden - 1)) == 0
    if pow2:
        # XOR butterfly over groups of `n_hidden` consecutive lanes: stays in lane
        # layout (no (tm, H, H) reshape -> no lane->sublane relayout). Rolls ride the
        # XLU slot; groups are H-lane aligned so wrapped lanes are never selected.
        shifts = []
        k = 1
        while k < n_hidden:
            shifts.append(k)
            k *= 2
        # Masks hoisted once and shared between the max- and sum-butterflies.
        lane = jax.lax.broadcasted_iota(jnp.int32, (1, wl), 1)
        masks = [(lane & k) == 0 for k in shifts]

        m = logits
        for k, msk in zip(shifts, masks):
            fwd = pltpu.roll(m, shift=wl - k, axis=1)   # partner at lane + k
            bwd = pltpu.roll(m, shift=k, axis=1)        # partner at lane - k
            m = jnp.maximum(m, jnp.where(msk, fwd, bwd))
    else:
        # Fallback for non power-of-two n_hidden: relayout path (slower, correct).
        tm = logits.shape[0]
        l3 = logits.reshape(tm, wl // n_hidden, n_hidden)
        m = jnp.broadcast_to(jnp.max(l3, axis=-1, keepdims=True),
                             l3.shape).reshape(tm, wl)

    z = logits - m
    # bf16 exp halves pressure on the single EUP pipe (v6e/v7x lever); ~1e-3 accuracy.
    e = jnp.exp(z.astype(jnp.bfloat16)) if bf16_exp else jnp.exp(z)   # EUP

    if (not mxu_group_sum) and pow2:
        # v5e path: per-group exp-sum via a roll/add XOR butterfly (XLU + idle VALU
        # slots) instead of an f32 matmul the bf16/int MXU would have to decompose.
        s = e.astype(jnp.float32)
        for k, msk in zip(shifts, masks):
            fwd = pltpu.roll(s, shift=wl - k, axis=1)
            bwd = pltpu.roll(s, shift=k, axis=1)
            s = s + jnp.where(msk, fwd, bwd)
    else:
        # v6e/v7x path: block-diagonal-ones matmul rides the otherwise-idle MXU.
        s = jnp.dot(e, g_ref[...].astype(e.dtype),
                    preferred_element_type=jnp.float32)

    # NOTE: pl.reciprocal(..., approx=True) would be free when the VPU is the binding
    # slot, but it doubles EUP pressure exactly where exp may already be critical
    # (v6e/v7x) -- keep exact unless profiling says otherwise.
    probs = e.astype(jnp.float32) * pl.reciprocal(s, approx=False)
    o_ref[...] = probs.astype(o_ref.dtype)


def _default_group_sum():
    # v5e's MXU is bf16/int-only: an f32 e@gmat matmul decomposes into multiple passes
    # and routes e through the MRF pop path, so prefer the XLU roll/add butterfly there;
    # keep the (otherwise idle) MXU group-sum on v6e / v7x.
    try:
        kind = jax.devices()[0].device_kind.lower()
    except Exception:
        return "mxu"
    return "butterfly" if "v5" in kind else "mxu"


def neural_module_forward(embs, weight_t, bias, n_hidden, temperature=1.0,
                          tm=2048, out_dtype=jnp.float32, group_sum="auto",
                          use_bf16_exp=False):
    """embs: (B, S, D) f32; weight_t: (D, H*H) (transpose of the PyTorch weight);
    bias: (H*H,).  Returns the softmax transition tensor of shape (B, S, H, H)."""
    B, S, D = embs.shape
    HH = n_hidden * n_hidden
    M = B * S

    if group_sum == "auto":
        group_sum = _default_group_sum()
    mxu_group_sum = (group_sum != "butterfly")

    # Fold 1/temperature into the tiny resident weight & bias once (wrapper-side).
    inv_t = jnp.float32(1.0 / float(temperature))
    w_s = weight_t.astype(jnp.float32) * inv_t
    b_s = bias.astype(jnp.float32) * inv_t

    # ---- token packing: P tokens per row so the output (and ideally the input) row
    # ---- width is a multiple of 128 lanes.  (D=32, H=8 -> P=4: Din=128, Wout=256.)
    if HH % 128 == 0 or 128 % HH != 0:
        P = 1
    else:
        base = 128 // HH
        P = base
        for mult in range(1, 9):
            cand = base * mult
            if cand * HH > 512:          # keep resident weight/gmat small
                break
            if (cand * D) % 128 == 0:    # make the packed input lane-dense too
                P = cand
                break
    Din, Wout = P * D, P * HH

    # Block-diagonal packed weight (P copies of w_s on the diagonal) and tiled bias.
    w_packed = jnp.zeros((Din, Wout), jnp.float32)
    for p in range(P):
        w_packed = w_packed.at[p * D:(p + 1) * D, p * HH:(p + 1) * HH].set(w_s)
    b_packed = jnp.tile(b_s, P).reshape(1, Wout)

    # Block-diagonal ones matrix for the MXU per-group exp-sum.
    gidx = jnp.arange(Wout) // n_hidden
    gmat = (gidx[:, None] == gidx[None, :]).astype(jnp.float32)

    # ---- tile sizing under an explicit VMEM budget.
    # Per packed row: double-buffered x/out tiles + ~6 materialized (tm, Wout) f32
    # intermediates around the two MXU ops.  Budget 48 MiB keeps us safe on v7x
    # (64 MiB physical) and we set vmem_limit_bytes explicitly (v5e default is 16 MiB).
    out_itemsize = jax.dtypes.canonicalize_dtype(out_dtype).itemsize
    bytes_per_row = 2 * (4 * Din + out_itemsize * Wout) + 6 * 4 * Wout
    resident_bytes = 4 * (Din * Wout + Wout + Wout * Wout)
    budget = 48 * 1024 * 1024
    tm_cap = max(16, ((budget - resident_bytes) // bytes_per_row) // 16 * 16)
    tm = max(16, (int(tm) // 16) * 16)
    tm = min(tm, tm_cap)

    Mp = pl.cdiv(M, P)                           # packed rows needed
    tm_eff = min(tm, ((Mp + 15) // 16) * 16)     # shrink tile for tiny inputs
    Mp_pad = pl.cdiv(Mp, tm_eff) * tm_eff
    M_pad = Mp_pad * P

    vmem_limit = int(min(budget,
                         max(32 * 1024 * 1024,
                             (resident_bytes + bytes_per_row * tm_eff) * 5 // 4)))

    x = embs.reshape(M, D).astype(jnp.float32)
    if M_pad != M:
        # Padded tokens see only the bias -> valid softmax rows, sliced off below.
        x = jnp.pad(x, ((0, M_pad - M), (0, 0)))
    xp = x.reshape(Mp_pad, Din)

    kernel = functools.partial(_neural_module_kernel, n_hidden=n_hidden,
                               mxu_group_sum=mxu_group_sum, bf16_exp=use_bf16_exp)
    out = pl.pallas_call(
        kernel,
        out_shape=jax.ShapeDtypeStruct((Mp_pad, Wout), out_dtype),
        grid_spec=pltpu.PrefetchScalarGridSpec(
            num_scalar_prefetch=0,
            grid=(Mp_pad // tm_eff,),
            in_specs=[
                pl.BlockSpec((tm_eff, Din), lambda i: (i, 0)),   # token tile
                pl.BlockSpec((Din, Wout), lambda i: (0, 0)),     # weight, resident in VMEM
                pl.BlockSpec((1, Wout), lambda i: (0, 0)),       # bias, resident
                pl.BlockSpec((Wout, Wout), lambda i: (0, 0)),    # group-sum ones, resident
            ],
            out_specs=pl.BlockSpec((tm_eff, Wout), lambda i: (i, 0)),
        ),
        compiler_params=pltpu.CompilerParams(
            dimension_semantics=("parallel",),   # v7x: token tiles split across both TCs
            vmem_limit_bytes=vmem_limit,
        ),
    )(xp, w_packed, b_packed, gmat)

    # NOTE(perf): this kernel is HBM-bound, so production consumers should take the
    # padded, lane-packed (Mp_pad, Wout) buffer directly; the reshape+slice below can
    # re-materialize the full output and is kept here only for the reference comparison.
    probs = out.reshape(M_pad, HH)[:M]
    return probs.reshape(B, S, n_hidden, n_hidden)


def init_params(key, d_emb, n_hidden):
    """Deterministic init matching NeuralModule.__init__:
    xavier_uniform_(weight, gain=calculate_gain('relu')); default PyTorch bias init."""
    HH = n_hidden * n_hidden
    k_w, k_b = jax.random.split(key)

    gain = jnp.sqrt(2.0)  # nn.init.calculate_gain('relu')
    fan_in, fan_out = d_emb, HH
    bound_w = gain * jnp.sqrt(6.0 / (fan_in + fan_out))
    # PyTorch weight shape is (out, in); store its transpose (in, out) for x @ w.
    weight_t = jax.random.uniform(
        k_w, (d_emb, HH), jnp.float32, minval=-bound_w, maxval=bound_w
    )

    bound_b = 1.0 / jnp.sqrt(fan_in)  # PyTorch default Linear bias init
    bias = jax.random.uniform(
        k_b, (HH,), jnp.float32, minval=-bound_b, maxval=bound_b
    )
    return weight_t, bias


if __name__ == "__main__":
    d_emb, n_hidden = 32, 8

    key = jax.random.PRNGKey(0)
    k_param, k_emb1, k_emb2 = jax.random.split(key, 3)
    weight_t, bias = init_params(k_param, d_emb, n_hidden)

    def reference(embs, temperature):
        B, S, _ = embs.shape
        logits = embs.reshape(-1, d_emb) @ weight_t + bias
        logits = logits.reshape(B, S, n_hidden, n_hidden) / temperature
        return jax.nn.softmax(logits, axis=-1)

    # Case 1: small module-consistent shapes (batch=2, seq=8), MXU group-sum path.
    embs1 = jax.random.normal(k_emb1, (2, 8, d_emb), jnp.float32)
    out1 = jax.block_until_ready(
        neural_module_forward(embs1, weight_t, bias, n_hidden,
                              temperature=1.0, group_sum="mxu"))
    ref1 = reference(embs1, 1.0)
    assert out1.shape == (2, 8, n_hidden, n_hidden)
    assert jnp.allclose(out1, ref1, atol=1e-5, rtol=1e-5)
    assert jnp.allclose(jnp.sum(out1, axis=-1), 1.0, atol=1e-5)

    # Case 2: odd token count (padding + 4-token lane packing), non-unit temperature,
    # and the v5e-oriented roll/add butterfly group-sum path.
    embs2 = jax.random.normal(k_emb2, (3, 37, d_emb), jnp.float32)
    out2 = jax.block_until_ready(
        neural_module_forward(embs2, weight_t, bias, n_hidden,
                              temperature=2.0, group_sum="butterfly"))
    ref2 = reference(embs2, 2.0)
    assert out2.shape == (3, 37, n_hidden, n_hidden)
    assert jnp.allclose(out2, ref2, atol=1e-5, rtol=1e-5)
    assert jnp.allclose(jnp.sum(out2, axis=-1), 1.0, atol=1e-5)

    # Case 3: bf16 output (mem-bound lever: ~33% less HBM traffic), auto group-sum.
    out3 = jax.block_until_ready(
        neural_module_forward(embs1, weight_t, bias, n_hidden,
                              temperature=1.0, out_dtype=jnp.bfloat16))
    assert out3.dtype == jnp.bfloat16
    assert jnp.allclose(out3.astype(jnp.float32), ref1, atol=1e-2, rtol=1e-2)

    # Case 4: bf16 exp path (EUP lever for v6e/v7x once the kernel flips compute-bound).
    out4 = jax.block_until_ready(
        neural_module_forward(embs2, weight_t, bias, n_hidden,
                              temperature=2.0, use_bf16_exp=True))
    assert jnp.allclose(out4, ref2, atol=5e-2, rtol=5e-2)
    assert jnp.allclose(jnp.sum(out4, axis=-1), 1.0, atol=1e-2)

    print("KERNEL_OK")
</pallas_src>

<mosaic_0001>
module attributes {stable_mosaic.version = 11 : i64} {
  func.func @_neural_module_kernel(%arg0: i32, %arg1: memref<16x128xf32, #tpu.memory_space<vmem>>, %arg2: memref<128x256xf32, #tpu.memory_space<vmem>>, %arg3: memref<1x256xf32, #tpu.memory_space<vmem>>, %arg4: memref<256x256xf32, #tpu.memory_space<vmem>>, %arg5: memref<16x256xf32, #tpu.memory_space<vmem>>) attributes {dimension_semantics = [#tpu.dimension_semantics<parallel>], iteration_bounds = array<i64: 1>, scalar_prefetch = 0 : i64, scratch_operands = 0 : i64, tpu.core_type = #tpu.core_type<tc>, window_params = [{transform_indices = @transform_0, window_bounds = array<i64: 16, 128>}, {pipeline_mode = #tpu.pipeline_mode<synchronous>, transform_indices = @transform_1, window_bounds = array<i64: 128, 256>}, {pipeline_mode = #tpu.pipeline_mode<synchronous>, transform_indices = @transform_2, window_bounds = array<i64: 1, 256>}, {pipeline_mode = #tpu.pipeline_mode<synchronous>, transform_indices = @transform_3, window_bounds = array<i64: 256, 256>}, {transform_indices = @transform_4, window_bounds = array<i64: 16, 256>}]} {
    %c0 = arith.constant 0 : index
    %c0_0 = arith.constant 0 : index
    %0 = vector.load %arg1[%c0, %c0_0] : memref<16x128xf32, #tpu.memory_space<vmem>>, vector<16x128xf32>
    %c0_1 = arith.constant 0 : index
    %c0_2 = arith.constant 0 : index
    %1 = vector.load %arg2[%c0_1, %c0_2] : memref<128x256xf32, #tpu.memory_space<vmem>>, vector<128x256xf32>
    %cst = arith.constant dense<0.000000e+00> : vector<16x256xf32>
    %2 = tpu.matmul %0, %1, %cst {dimension_numbers = #tpu.dot_dimension_numbers<[1], [0], [0], [1], [0, 0, 1, 1], [], []>} : vector<16x128xf32>, vector<128x256xf32>, vector<16x256xf32> -> vector<16x256xf32>
    %c0_3 = arith.constant 0 : index
    %c0_4 = arith.constant 0 : index
    %3 = vector.load %arg3[%c0_3, %c0_4] : memref<1x256xf32, #tpu.memory_space<vmem>>, vector<1x256xf32>
    %4 = vector.broadcast %3 : vector<1x256xf32> to vector<16x256xf32>
    %5 = arith.addf %2, %4 : vector<16x256xf32>
    %6 = tpu.iota {dimensions = array<i32: 1>} : vector<1x256xi32>
    %c1_i32 = arith.constant 1 : i32
    %7 = vector.broadcast %c1_i32 : i32 to vector<1x256xi32>
    %8 = arith.andi %6, %7 : vector<1x256xi32>
    %c0_i32 = arith.constant 0 : i32
    %9 = vector.broadcast %c0_i32 : i32 to vector<1x256xi32>
    %10 = arith.cmpi eq, %8, %9 : vector<1x256xi32>
    %c2_i32 = arith.constant 2 : i32
    %11 = vector.broadcast %c2_i32 : i32 to vector<1x256xi32>
    %12 = arith.andi %6, %11 : vector<1x256xi32>
    %c0_i32_5 = arith.constant 0 : i32
    %13 = vector.broadcast %c0_i32_5 : i32 to vector<1x256xi32>
    %14 = arith.cmpi eq, %12, %13 : vector<1x256xi32>
    %c4_i32 = arith.constant 4 : i32
    %15 = vector.broadcast %c4_i32 : i32 to vector<1x256xi32>
    %16 = arith.andi %6, %15 : vector<1x256xi32>
    %c0_i32_6 = arith.constant 0 : i32
    %17 = vector.broadcast %c0_i32_6 : i32 to vector<1x256xi32>
    %18 = arith.cmpi eq, %16, %17 : vector<1x256xi32>
    %c255_i32 = arith.constant 255 : i32
    %19 = tpu.dynamic_rotate %5 by %c255_i32 dim 1 : vector<16x256xf32>, i32 -> vector<16x256xf32>
    %c1_i32_7 = arith.constant 1 : i32
    %20 = tpu.dynamic_rotate %5 by %c1_i32_7 dim 1 : vector<16x256xf32>, i32 -> vector<16x256xf32>
    %21 = vector.shape_cast %10 : vector<1x256xi1> to vector<1x256xi1>
    %22 = vector.broadcast %21 : vector<1x256xi1> to vector<16x256xi1>
    %23 = arith.select %22, %19, %20 : vector<16x256xi1>, vector<16x256xf32>
    %24 = arith.maximumf %5, %23 : vector<16x256xf32>
    %c254_i32 = arith.constant 254 : i32
    %25 = tpu.dynamic_rotate %24 by %c254_i32 dim 1 : vector<16x256xf32>, i32 -> vector<16x256xf32>
    %c2_i32_8 = arith.constant 2 : i32
    %26 = tpu.dynamic_rotate %24 by %c2_i32_8 dim 1 : vector<16x256xf32>, i32 -> vector<16x256xf32>
    %27 = vector.shape_cast %14 : vector<1x256xi1> to vector<1x256xi1>
    %28 = vector.broadcast %27 : vector<1x256xi1> to vector<16x256xi1>
    %29 = arith.select %28, %25, %26 : vector<16x256xi1>, vector<16x256xf32>
    %30 = arith.maximumf %24, %29 : vector<16x256xf32>
    %c252_i32 = arith.constant 252 : i32
    %31 = tpu.dynamic_rotate %30 by %c252_i32 dim 1 : vector<16x256xf32>, i32 -> vector<16x256xf32>
    %c4_i32_9 = arith.constant 4 : i32
    %32 = tpu.dynamic_rotate %30 by %c4_i32_9 dim 1 : vector<16x256xf32>, i32 -> vector<16x256xf32>
    %33 = vector.shape_cast %18 : vector<1x256xi1> to vector<1x256xi1>
    %34 = vector.broadcast %33 : vector<1x256xi1> to vector<16x256xi1>
    %35 = arith.select %34, %31, %32 : vector<16x256xi1>, vector<16x256xf32>
    %36 = arith.maximumf %30, %35 : vector<16x256xf32>
    %37 = arith.subf %5, %36 : vector<16x256xf32>
    %38 = math.exp %37 : vector<16x256xf32>
    %c0_10 = arith.constant 0 : index
    %c0_11 = arith.constant 0 : index
    %39 = vector.load %arg4[%c0_10, %c0_11] : memref<256x256xf32, #tpu.memory_space<vmem>>, vector<256x256xf32>
    %cst_12 = arith.constant dense<0.000000e+00> : vector<16x256xf32>
    %40 = tpu.matmul %38, %39, %cst_12 {dimension_numbers = #tpu.dot_dimension_numbers<[1], [0], [0], [1], [0, 0, 1, 1], [], []>} : vector<16x256xf32>, vector<256x256xf32>, vector<16x256xf32> -> vector<16x256xf32>
    %41 = tpu.reciprocal %40 : vector<16x256xf32> -> vector<16x256xf32>
    %42 = arith.mulf %38, %41 : vector<16x256xf32>
    %c0_13 = arith.constant 0 : index
    %c0_14 = arith.constant 0 : index
    %43 = vector.load %arg5[%c0_13, %c0_14] : memref<16x256xf32, #tpu.memory_space<vmem>>, vector<16x256xf32>
    tpu.vector_store %arg5[%c0_13, %c0_14], %42 {strides = array<i32>} : memref<16x256xf32, #tpu.memory_space<vmem>>, vector<16x256xf32>,
    return
  }
  func.func @transform_0(%arg0: i32) -> (i32, i32) {
    %c0_i32 = arith.constant 0 : i32
    %c0_i32_0 = arith.constant 0 : i32
    return %arg0, %c0_i32 : i32, i32
  }
  func.func @transform_1(%arg0: i32) -> (i32, i32) {
    %c0_i32 = arith.constant 0 : i32
    %c0_i32_0 = arith.constant 0 : i32
    %c0_i32_1 = arith.constant 0 : i32
    return %c0_i32, %c0_i32_0 : i32, i32
  }
  func.func @transform_2(%arg0: i32) -> (i32, i32) {
    %c0_i32 = arith.constant 0 : i32
    %c0_i32_0 = arith.constant 0 : i32
    %c0_i32_1 = arith.constant 0 : i32
    return %c0_i32, %c0_i32_0 : i32, i32
  }
  func.func @transform_3(%arg0: i32) -> (i32, i32) {
    %c0_i32 = arith.constant 0 : i32
    %c0_i32_0 = arith.constant 0 : i32
    %c0_i32_1 = arith.constant 0 : i32
    return %c0_i32, %c0_i32_0 : i32, i32
  }
  func.func @transform_4(%arg0: i32) -> (i32, i32) {
    %c0_i32 = arith.constant 0 : i32
    %c0_i32_0 = arith.constant 0 : i32
    return %arg0, %c0_i32 : i32, i32
  }
}

</mosaic_0001>

<bundles_post_ra>
// kernel: tpu_custom_call.1
= control target key start
LH: loop header
LB: loop body
LE: loop exit
PB: predicated region body
PF: predicated region fallthrough
CT: control target
= control target key end

     0   :  { %9 = vsyncpa [#allocation3], 0  ;;  %s983_s0 = inlined_call_operand.hbm [shape: f32[16,128], index: 0, kind: input, shape index: {}]   ;;  %s984_s1 = inlined_call_operand.hbm [shape: f32[128,256], index: 1, kind: input, shape index: {}]   ;;  %s985_s2 = inlined_call_operand.vmem [shape: f32[1,256], index: 2, kind: input, shape index: {}]   ;;  %s986_s3 = inlined_call_operand.hbm [shape: f32[256,256], index: 3, kind: input, shape index: {}]   ;;  %s987_s4 = inlined_call_operand.hbm [shape: f32[16,256], index: 4, kind: output, shape index: {}]  }
   0x1   :  { %10 = vsyncpa [#allocation6], 0 }
   0x2   :  { %11 = vsyncpa [#allocation4], 0  ;;  %s715_s15 = smov [#allocation5]   ;;  %s621_s19 = scalar_lea.hbm %s984_s1, 4096 }
   0x3   :  { %s29_s16 = sshll.u32 %s715_s15, 4  ;;  %p622_p0 = scmp.ne.s32.totalorder %s984_s1, %s621_s19  ;;  %s30_s16 = int_to_ptr.vmem [resolvable:$true] %s29_s16 }
   0x4   :  { %p625_p1 = scmp.lt.u32.totalorder %s621_s19, %s984_s1 }
   0x6   :  { %p627_p2 = pnand %p625_p1, %p622_p0 }
   0x8   :  { %630 = shalt.err (!%p627_p2)
}
   0x9   :  { %s631_s24 = scalar_lea.vmem %s30_s16, 4096  ;;  %p636_p4 = scmp.lt.s32.totalorder %s30_s16, %s30_s16 }
   0xa   :  { %p632_p3 = scmp.ne.s32.totalorder %s30_s16, %s631_s24  ;;  %p637_p5 = scmp.lt.s32.totalorder %s631_s24, %s631_s24 }
   0xc   :  { %p638_p6 = por %p637_p5, %p636_p4 }
   0xe   :  { %p639_p7 = pnand %p638_p6, %p632_p3 }
  0x10   :  { %642 = shalt.err (!%p639_p7)
}
  0x11   :  { %s716_s25 = smov 256   ;;  %s717_s26 = smov 16  }
  0x12   :  { %35 = dma.hbm_to_vmem [thread:$0]  %s984_s1, 4096, %s30_s16, [#allocation6], %s716_s25, %s716_s25, %s717_s26  }
  0x13   :  { %s718_s29 = smov [#allocation2]   ;;  %s643_s7 = scalar_lea.hbm %s983_s0, 256 }
  0x14   :  { %s17_s30 = sshll.u32 %s718_s29, 4  ;;  %p644_p8 = scmp.ne.s32.totalorder %s983_s0, %s643_s7  ;;  %s18_s30 = int_to_ptr.vmem [resolvable:$true] %s17_s30 }
  0x15   :  { %p647_p9 = scmp.lt.u32.totalorder %s643_s7, %s983_s0 }
  0x17   :  { %p649_p10 = pnand %p647_p9, %p644_p8 }
  0x19   :  { %652 = shalt.err (!%p649_p10)
}
  0x1a   :  { %s653_s12 = scalar_lea.vmem %s18_s30, 256  ;;  %p658_p12 = scmp.lt.s32.totalorder %s18_s30, %s18_s30 }
  0x1b   :  { %p654_p11 = scmp.ne.s32.totalorder %s18_s30, %s653_s12  ;;  %p659_p13 = scmp.lt.s32.totalorder %s653_s12, %s653_s12 }
  0x1d   :  { %p660_p0 = por %p659_p13, %p658_p12 }
  0x1f   :  { %p661_p1 = pnand %p660_p0, %p654_p11 }
  0x21   :  { %664 = shalt.err (!%p661_p1)
}
  0x22   :  { %s719_s1 = smov 128   ;;  %s720_s13 = smov 8  }
  0x23   :  { %23 = dma.hbm_to_vmem [thread:$0]  %s983_s0, 256, %s18_s30, [#allocation3], %s719_s1, %s719_s1, %s720_s13  }
  0x24   :  { %s721_s16 = smov [#allocation7]   ;;  %s665_s20 = scalar_lea.hbm %s986_s3, 8192 }
  0x25   :  { %s43_s17 = sshll.u32 %s721_s16, 4  ;;  %p666_p2 = scmp.ne.s32.totalorder %s986_s3, %s665_s20  ;;  %s44_s17 = int_to_ptr.vmem [resolvable:$true] %s43_s17 }
  0x26   :  { %p669_p3 = scmp.lt.u32.totalorder %s665_s20, %s986_s3 }
  0x28   :  { %p671_p4 = pnand %p669_p3, %p666_p2 }
  0x2a   :  { %674 = shalt.err (!%p671_p4)
}
  0x2b   :  { %s675_s27 = scalar_lea.vmem %s44_s17, 8192  ;;  %p680_p6 = scmp.lt.s32.totalorder %s44_s17, %s44_s17 }
  0x2c   :  { %p676_p5 = scmp.ne.s32.totalorder %s44_s17, %s675_s27  ;;  %p681_p7 = scmp.lt.s32.totalorder %s675_s27, %s675_s27 }
  0x2e   :  { %p682_p8 = por %p681_p7, %p680_p6 }
  0x30   :  { %p683_p9 = pnand %p682_p8, %p676_p5 }
  0x32   :  { %686 = shalt.err (!%p683_p9)
}
  0x33   :  { %49 = dma.hbm_to_vmem [thread:$0]  %s986_s3, 8192, %s44_s17, [#allocation6], %s716_s25, %s716_s25, %s717_s26  }
  0x34   :  { %709 = dma.done.wait [#allocation3], 256  }
  0x35   :  { %710 = vsyncadd [#allocation3], 4294967040 }
  0x36   :  { %711 = dma.done.wait [#allocation6], 12288  }
  0x37   :  { %712 = vsyncadd [#allocation6], 4294955008  ;;  %v722_v0 = vmov 0.0   ;;  %v62_v1 = vld [vmem:[#allocation5 + $0x8] sm:$0xff]  ;;  %v64_v2 = vld [vmem:[#allocation5 + $0x18] sm:$0xff]  ;;  %v95_v51 = vlaneseq  ;;  %s723_s30 = smov 1  }
  0x38   :  { %169 = vmatprep.mubr.f32.mxu0 %v722_v0  ;;  %v61_v3 = vld [vmem:[#allocation5] sm:$0xff]  ;;  %v494_v4 = vpack.c.bf16 %v64_v2, %v62_v1  ;;  %v63_v5 = vld [vmem:[#allocation5 + $0x10] sm:$0xff]  ;;  %v66_v6 = vld [vmem:[#allocation5 + $0x28] sm:$0xff]  ;;  %s724_s5 = smov 127   ;;  %s726_s6 = smov 2  }
  0x39   :  { %v68_v7 = vld [vmem:[#allocation5 + $0x38] sm:$0xff]  ;;  %v496_v8 = vpack.c.bf16 %v63_v5, %v61_v3  ;;  %v65_v10 = vld [vmem:[#allocation5 + $0x20] sm:$0xff]  ;;  %v67_v11 = vld [vmem:[#allocation5 + $0x30] sm:$0xff]  ;;  %v96_v52 = vshrl.u32 %v95_v51, 7  ;;  %v818_v2 = vand.u32 127, %v95_v51  ;;  %s727_s7 = smov 124  }
  0x3a   :  { %v498_v9 = vpack.c.bf16 %v68_v7, %v66_v6  ;;  %v70_v12 = vld [vmem:[#allocation5 + $0x48] sm:$0xff]  ;;  %495 = vmatprep.subr.bf16.mxu0 %v494_v4  ;;  %v72_v13 = vld [vmem:[#allocation5 + $0x58] sm:$0xff]  ;;  %v500_v14 = vpack.c.bf16 %v67_v11, %v65_v10  ;;  %v69_v16 = vld [vmem:[#allocation5 + $0x40] sm:$0xff]  ;;  %s728_s8 = smov 4   ;;  %s729_s9 = smov [#allocation8]  }
  0x3b   :  { %497 = vmatpush1.bf16.msra.mxu0 %v496_v8  ;;  %v502_v15 = vpack.c.bf16 %v72_v13, %v70_v12  ;;  %v71_v17 = vld [vmem:[#allocation5 + $0x50] sm:$0xff]  ;;  %v74_v18 = vld [vmem:[#allocation5 + $0x68] sm:$0xff]  ;;  %v76_v19 = vld [vmem:[#allocation5 + $0x78] sm:$0xff]  ;;  %v97_v53 = vsub.s32 0, %v96_v52  ;;  %v101_v56 = vsub.s32 1, %v96_v52  ;;  %v821_v3 = vadd.s32 128, %v818_v2 }
  0x3c   :  { %499 = vmatprep.subr.bf16.mxu0 %v498_v9  ;;  %v504_v20 = vpack.c.bf16 %v71_v17, %v69_v16  ;;  %v506_v21 = vpack.c.bf16 %v76_v19, %v74_v18  ;;  %v73_v22 = vld [vmem:[#allocation5 + $0x60] sm:$0xff]  ;;  %v75_v23 = vld [vmem:[#allocation5 + $0x70] sm:$0xff]  ;;  %v78_v24 = vld [vmem:[#allocation5 + $0x88] sm:$0xff]  ;;  %v185_v4 = vand.u32 1, %v818_v2  ;;  %vm218_vm0 = vcmp.lt.s32.totalorder %v818_v2, 1  ;;  %s481_s10 = sshll.u32 %s729_s9, 4  ;;  %s482_s10 = int_to_ptr.vmem [resolvable:$true] %s481_s10 }
  0x3d   :  { %v80_v25 = vld [vmem:[#allocation5 + $0x98] sm:$0xff]  ;;  %v508_v26 = vpack.c.bf16 %v75_v23, %v73_v22  ;;  %v77_v28 = vld [vmem:[#allocation5 + $0x80] sm:$0xff]  ;;  %v79_v29 = vld [vmem:[#allocation5 + $0x90] sm:$0xff]  ;;  %v186_v5 = vand.u32 1, %v821_v3  ;;  %vm205_vm1 = vcmp.lt.s32.totalorder %v818_v2, 127  ;;  %vm243_vm4 = vcmp.lt.s32.totalorder %v818_v2, 126  ;;  %p692_p11 = scmp.lt.s32.totalorder %s482_s10, %s482_s10 }
  0x3e   :  { %v510_v27 = vpack.c.bf16 %v80_v25, %v78_v24  ;;  %v82_v30 = vld [vmem:[#allocation5 + $0xa8] sm:$0xff]  ;;  %v84_v31 = vld [vmem:[#allocation5 + $0xb8] sm:$0xff]  ;;  %v512_v32 = vpack.c.bf16 %v79_v29, %v77_v28  ;;  %v81_v34 = vld [vmem:[#allocation5 + $0xa0] sm:$0xff]  ;;  %vm827_vm2 = vcmp.eq.s32.totalorder %v185_v4, 0  ;;  %vm256_vm5 = vcmp.lt.s32.totalorder %v818_v2, 2  ;;  %s687_s11 = scalar_lea.vmem %s482_s10, 512 }
  0x3f   :  { %501 = vmatpush1.bf16.msra.mxu0 %v500_v14  ;;  %v514_v33 = vpack.c.bf16 %v84_v31, %v82_v30  ;;  %v83_v35 = vld [vmem:[#allocation5 + $0xb0] sm:$0xff]  ;;  %v86_v36 = vld [vmem:[#allocation5 + $0xc8] sm:$0xff]  ;;  %v88_v37 = vld [vmem:[#allocation5 + $0xd8] sm:$0xff]  ;;  %vm831_vm3 = vcmp.eq.s32.totalorder %v186_v5, 0  ;;  %vm281_vm8 = vcmp.lt.s32.totalorder %v818_v2, 124  ;;  %vm294_vm9 = vcmp.lt.s32.totalorder %v818_v2, 4  ;;  %p688_p10 = scmp.ne.s32.totalorder %s482_s10, %s687_s11  ;;  %p693_p12 = scmp.lt.s32.totalorder %s687_s11, %s687_s11 }
  0x40   :  { %503 = vmatprep.subr.bf16.mxu0 %v502_v15  ;;  %v516_v38 = vpack.c.bf16 %v83_v35, %v81_v34  ;;  %v518_v39 = vpack.c.bf16 %v88_v37, %v86_v36  ;;  %v85_v40 = vld [vmem:[#allocation5 + $0xc0] sm:$0xff]  ;;  %v87_v41 = vld [vmem:[#allocation5 + $0xd0] sm:$0xff]  ;;  %v90_v42 = vld [vmem:[#allocation5 + $0xe8] sm:$0xff] }
  0x41   :  { %v92_v43 = vld [vmem:[#allocation5 + $0xf8] sm:$0xff]  ;;  %v520_v44 = vpack.c.bf16 %v87_v41, %v85_v40  ;;  %v89_v46 = vld [vmem:[#allocation5 + $0xe0] sm:$0xff]  ;;  %v91_v47 = vld [vmem:[#allocation5 + $0xf0] sm:$0xff]  ;;  %p694_p13 = por %p693_p12, %p692_p11 }
  0x42   :  { %v522_v45 = vpack.c.bf16 %v92_v43, %v90_v42  ;;  %v524_v48 = vpack.c.bf16 %v91_v47, %v89_v46  ;;  %v59_v49 = vld [vmem:[#allocation2] sm:$0xff]  ;;  %v60_v50 = vld [vmem:[#allocation2 + $0x8] sm:$0xff]  ;;  %v323_v34 = vld [vmem:[#allocation7] sm:$0xff] }
  0x43   :  { %505 = vmatpush1.bf16.msra.mxu0 %v504_v20  ;;  %v93_v54 = vld [vmem:[%s985_s2] sm:$0x3]  ;;  %s725_s2 = smov 126   ;;  %v328_v37 = vld [vmem:[#allocation7 + $0x28] sm:$0xff]  ;;  %v327_v41 = vld [vmem:[#allocation7 + $0x20] sm:$0xff]  ;;  %p695_p0 = pnand %p694_p13, %p688_p10 }
  0x44   :  { %507 = vmatprep.subr.bf16.mxu0 %v506_v21  ;;  %v98_v55 = vrot.slane %v93_v54, %v97_v53  ;;  %v102_v59 = vrot.slane %v93_v54, %v101_v56  ;;  %v325_v36 = vld [vmem:[#allocation7 + $0x10] sm:$0xff]  ;;  %v332_v43 = vld [vmem:[#allocation7 + $0x48] sm:$0xff]  ;;  %v331_v47 = vld [vmem:[#allocation7 + $0x40] sm:$0xff] }
  0x45   :  { %v329_v42 = vld [vmem:[#allocation7 + $0x30] sm:$0xff]  ;;  %v335_v53 = vld [vmem:[#allocation7 + $0x60] sm:$0xff]  ;;  %v342_v56 = vld [vmem:[#allocation7 + $0x98] sm:$0xff] }
  0x46   :  { %v337_v54 = vld [vmem:[#allocation7 + $0x70] sm:$0xff]  ;;  %v346_v4 = vld [vmem:[#allocation7 + $0xb8] sm:$0xff]  ;;  %v348_v9 = vld [vmem:[#allocation7 + $0xc8] sm:$0xff] }
  0x47   :  { %509 = vmatpush1.bf16.msra.mxu0 %v508_v26  ;;  %v345_v8 = vld [vmem:[#allocation7 + $0xb0] sm:$0xff] }
  0x48   :  { %511 = vmatprep.subr.bf16.mxu0 %v510_v27 }
  0x4b   :  { %513 = vmatpush1.bf16.msra.mxu0 %v512_v32  ;;  %v324_v32 = vld [vmem:[#allocation7 + $0x8] sm:$0xff] }
  0x4c   :  { %515 = vmatprep.subr.bf16.mxu0 %v514_v33  ;;  %v326_v33 = vld [vmem:[#allocation7 + $0x18] sm:$0xff] }
  0x4d   :  { %v526_v35 = vpack.c.bf16 %v326_v33, %v324_v32  ;;  %v362_v32 = vld [vmem:[#allocation7 + $0x138] sm:$0xff] }
  0x4f   :  { %517 = vmatpush1.bf16.msra.mxu0 %v516_v38  ;;  %v330_v38 = vld [vmem:[#allocation7 + $0x38] sm:$0xff]  ;;  %527 = vmatprep.subr.bf16.mxu1 %v526_v35  ;;  %v359_v35 = vld [vmem:[#allocation7 + $0x120] sm:$0xff] }
  0x50   :  { %519 = vmatprep.subr.bf16.mxu0 %v518_v39  ;;  %v528_v39 = vpack.c.bf16 %v325_v36, %v323_v34  ;;  %v530_v40 = vpack.c.bf16 %v330_v38, %v328_v37  ;;  %v361_v36 = vld [vmem:[#allocation7 + $0x130] sm:$0xff]  ;;  %v364_v38 = vld [vmem:[#allocation7 + $0x148] sm:$0xff] }
  0x51   :  { %v564_v37 = vpack.c.bf16 %v361_v36, %v359_v35 }
  0x52   :  { %529 = vmatpush1.bf16.msra.mxu1 %v528_v39  ;;  %v366_v39 = vld [vmem:[#allocation7 + $0x158] sm:$0xff] }
  0x53   :  { %521 = vmatpush1.bf16.msra.mxu0 %v520_v44  ;;  %v334_v44 = vld [vmem:[#allocation7 + $0x58] sm:$0xff]  ;;  %531 = vmatprep.subr.bf16.mxu1 %v530_v40  ;;  %v566_v40 = vpack.c.bf16 %v366_v39, %v364_v38  ;;  %v384_v38 = vld [vmem:[#allocation7 + $0x1e8] sm:$0xff] }
  0x54   :  { %523 = vmatprep.subr.bf16.mxu0 %v522_v45  ;;  %v532_v45 = vpack.c.bf16 %v329_v42, %v327_v41  ;;  %v534_v46 = vpack.c.bf16 %v334_v44, %v332_v43  ;;  %v363_v41 = vld [vmem:[#allocation7 + $0x140] sm:$0xff]  ;;  %v365_v42 = vld [vmem:[#allocation7 + $0x150] sm:$0xff]  ;;  %v368_v44 = vld [vmem:[#allocation7 + $0x168] sm:$0xff] }
  0x55   :  { %v568_v43 = vpack.c.bf16 %v365_v42, %v363_v41  ;;  %v386_v39 = vld [vmem:[#allocation7 + $0x1f8] sm:$0xff] }
  0x56   :  { %533 = vmatpush1.bf16.msra.mxu1 %v532_v45  ;;  %v370_v45 = vld [vmem:[#allocation7 + $0x178] sm:$0xff]  ;;  %v586_v42 = vpack.c.bf16 %v386_v39, %v384_v38 }
  0x57   :  { %525 = vmatpush1.bf16.msra.mxu0 %v524_v48  ;;  %v333_v48 = vld [vmem:[#allocation7 + $0x50] sm:$0xff]  ;;  %535 = vmatprep.subr.bf16.mxu1 %v534_v46  ;;  %v189_v46 = vand.u32 2, %v818_v2 }
  0x58   :  { %v536_v51 = vpack.c.bf16 %v333_v48, %v331_v47  ;;  %v190_v47 = vand.u32 2, %v821_v3  ;;  %v570_v48 = vpack.c.bf16 %v370_v45, %v368_v44  ;;  %v385_v44 = vld [vmem:[#allocation7 + $0x1f0] sm:$0xff] }
  0x59   :  { %vm883_vm6 = vcmp.eq.s32.totalorder %v189_v46, 0  ;;  %v193_v46 = vand.u32 4, %v818_v2 }
  0x5a   :  { %170 = vmatmul.mubr.f32.vlgmr.msra.gmra.mrb[0].mxu0 %v59_v49  ;;  %v336_v49 = vld [vmem:[#allocation7 + $0x68] sm:$0xff]  ;;  %537 = vmatpush1.bf16.msra.mxu1 %v536_v51  ;;  %vm887_vm7 = vcmp.eq.s32.totalorder %v190_v47, 0  ;;  %v194_v47 = vand.u32 4, %v821_v3 }
  0x5b   :  { %175 = vmatprep.mubr.f32.mxu0 %v722_v0  ;;  %vm931_vm10 = vcmp.eq.s32.totalorder %v193_v46, 0 }
  0x5c   :  { %vm935_vm11 = vcmp.eq.s32.totalorder %v194_v47, 0 }
  0x5e   :  { %176 = vmatmul.mubr.f32.gmra.mrb[2].mxu0 %v60_v50  ;;  %v338_v50 = vld [vmem:[#allocation7 + $0x78] sm:$0xff] }
  0x5f   :  { %v538_v52 = vpack.c.bf16 %v338_v50, %v336_v49  ;;  %v367_v49 = vld [vmem:[#allocation7 + $0x160] sm:$0xff]  ;;  %v369_v50 = vld [vmem:[#allocation7 + $0x170] sm:$0xff] }
  0x61   :  { %539 = vmatprep.subr.bf16.mxu1 %v538_v52 }
 0x12d   :  { %v171_v57 = vpop.f32.mrb[0].mxu0 }
 0x12e   :  { %v802_v58 = vadd.f32 %v171_v57, %v98_v55  ;;  %v173_v60 = vpop.f32.mrb[1].mxu0  ;;  %v540_v57 = vpack.c.bf16 %v337_v54, %v335_v53  ;;  %v572_v53 = vpack.c.bf16 %v369_v50, %v367_v49  ;;  %v372_v54 = vld [vmem:[#allocation7 + $0x188] sm:$0xff] }
 0x12f   :  { %v806_v62 = vadd.f32 %v173_v60, %v102_v59  ;;  %v339_v60 = vld [vmem:[#allocation7 + $0x80] sm:$0xff] }
 0x130   :  { %210 = vrot.lane.b32.xlu1 %v802_v58, %s723_s30  ;;  %197 = vrot.lane.b32.xlu0 %v802_v58, %s724_s5 }
 0x131   :  { %v177_v61 = vpop.f32.mrb[2].mxu0  ;;  %541 = vmatpush1.bf16.msra.mxu1 %v540_v57 }
 0x132   :  { %v179_v63 = vpop.f32.mrb[3].mxu0  ;;  %v808_v0 = vadd.f32 %v177_v61, %v98_v55  ;;  %v340_v55 = vld [vmem:[#allocation7 + $0x88] sm:$0xff]  ;;  %v341_v61 = vld [vmem:[#allocation7 + $0x90] sm:$0xff] }
 0x133   :  { %v810_v1 = vadd.f32 %v179_v63, %v102_v59  ;;  %v542_v59 = vpack.c.bf16 %v342_v56, %v340_v55  ;;  %v344_v63 = vld [vmem:[#allocation7 + $0xa8] sm:$0xff]  ;;  %v544_v5 = vpack.c.bf16 %v341_v61, %v339_v60  ;;  %v374_v55 = vld [vmem:[#allocation7 + $0x198] sm:$0xff]  ;;  %v371_v60 = vld [vmem:[#allocation7 + $0x180] sm:$0xff] }
 0x134   :  { %214 = vrot.lane.b32.xlu1 %v806_v62, %s723_s30  ;;  %201 = vrot.lane.b32.xlu0 %v806_v62, %s724_s5  ;;  %v373_v61 = vld [vmem:[#allocation7 + $0x190] sm:$0xff] }
 0x135   :  { %543 = vmatprep.subr.bf16.mxu1 %v542_v59  ;;  %v574_v59 = vpack.c.bf16 %v374_v55, %v372_v54 }
 0x136   :  { %545 = vmatpush1.bf16.msra.mxu1 %v544_v5  ;;  %v576_v5 = vpack.c.bf16 %v373_v61, %v371_v60 }
 0x138   :  { %203 = vrot.lane.b32.xlu1 %v810_v1, %s724_s5  ;;  %199 = vrot.lane.b32.xlu0 %v808_v0, %s724_s5 }
 0x13c   :  { %216 = vrot.lane.b32.xlu1 %v810_v1, %s723_s30  ;;  %212 = vrot.lane.b32.xlu0 %v808_v0, %s723_s30 }
 0x1a2   :  { %v211_v6 = vpop.permute.xlu1 %210  ;;  %v198_v7 = vpop.permute.xlu0 %197 }
 0x1a6   :  { %v215_v10 = vpop.permute.xlu1 %214  ;;  %v202_v11 = vpop.permute.xlu0 %201 }
 0x1a7   :  { %v219_v12 = vsel %vm218_vm0, %v211_v6, %v215_v10  ;;  %v221_v13 = vsel %vm218_vm0, %v215_v10, %v211_v6  ;;  %v206_v14 = vsel %vm205_vm1, %v198_v7, %v202_v11  ;;  %v208_v15 = vsel %vm205_vm1, %v202_v11, %v198_v7  ;;  %v343_v7 = vld [vmem:[#allocation7 + $0xa0] sm:$0xff]  ;;  %v350_v10 = vld [vmem:[#allocation7 + $0xd8] sm:$0xff] }
 0x1a8   :  { %v227_v16 = vsel %vm827_vm2, %v206_v14, %v221_v13  ;;  %v228_v17 = vsel %vm831_vm3, %v208_v15, %v219_v12  ;;  %v546_v6 = vpack.c.bf16 %v346_v4, %v344_v63  ;;  %v548_v11 = vpack.c.bf16 %v345_v8, %v343_v7  ;;  %v347_v13 = vld [vmem:[#allocation7 + $0xc0] sm:$0xff]  ;;  %v349_v14 = vld [vmem:[#allocation7 + $0xd0] sm:$0xff]  ;;  %v352_v15 = vld [vmem:[#allocation7 + $0xe8] sm:$0xff] }
 0x1a9   :  { %v848_v18 = vmax.f32 %v806_v62, %v228_v17  ;;  %v851_v19 = vmax.f32 %v802_v58, %v227_v16  ;;  %v550_v12 = vpack.c.bf16 %v350_v10, %v348_v9  ;;  %v354_v16 = vld [vmem:[#allocation7 + $0xf8] sm:$0xff]  ;;  %v552_v17 = vpack.c.bf16 %v349_v14, %v347_v13 }
 0x1aa   :  { %v204_v20 = vpop.permute.xlu1 %203  ;;  %v200_v21 = vpop.permute.xlu0 %199  ;;  %547 = vmatprep.subr.bf16.mxu1 %v546_v6  ;;  %v378_v13 = vld [vmem:[#allocation7 + $0x1b8] sm:$0xff] }
 0x1ab   :  { %239 = vrot.lane.b32.xlu1 %v848_v18, %s725_s2  ;;  %235 = vrot.lane.b32.xlu0 %v851_v19, %s725_s2  ;;  %v207_v22 = vsel %vm205_vm1, %v200_v21, %v204_v20  ;;  %v209_v25 = vsel %vm205_vm1, %v204_v20, %v200_v21  ;;  %v554_v20 = vpack.c.bf16 %v354_v16, %v352_v15  ;;  %v351_v21 = vld [vmem:[#allocation7 + $0xe0] sm:$0xff] }
 0x1ac   :  { %549 = vmatpush1.bf16.msra.mxu1 %v548_v11 }
 0x1ad   :  { %551 = vmatprep.subr.bf16.mxu1 %v550_v12  ;;  %v376_v12 = vld [vmem:[#allocation7 + $0x1a8] sm:$0xff] }
 0x1ae   :  { %v217_v23 = vpop.permute.xlu1 %216  ;;  %v213_v24 = vpop.permute.xlu0 %212  ;;  %v578_v16 = vpack.c.bf16 %v378_v13, %v376_v12 }
 0x1af   :  { %v220_v26 = vsel %vm218_vm0, %v213_v24, %v217_v23  ;;  %v222_v27 = vsel %vm218_vm0, %v217_v23, %v213_v24  ;;  %252 = vrot.lane.b32.xlu1 %v848_v18, %s726_s6  ;;  %248 = vrot.lane.b32.xlu0 %v851_v19, %s726_s6  ;;  %v356_v23 = vld [vmem:[#allocation7 + $0x108] sm:$0xff]  ;;  %v358_v24 = vld [vmem:[#allocation7 + $0x118] sm:$0xff] }
 0x1b0   :  { %v229_v28 = vsel %vm827_vm2, %v207_v22, %v222_v27  ;;  %v230_v29 = vsel %vm831_vm3, %v209_v25, %v220_v26  ;;  %v353_v22 = vld [vmem:[#allocation7 + $0xf0] sm:$0xff]  ;;  %553 = vmatpush1.bf16.msra.mxu1 %v552_v17  ;;  %v558_v26 = vpack.c.bf16 %v358_v24, %v356_v23  ;;  %v355_v27 = vld [vmem:[#allocation7 + $0x100] sm:$0xff]  ;;  %v380_v24 = vld [vmem:[#allocation7 + $0x1c8] sm:$0xff] }
 0x1b1   :  { %v870_v30 = vmax.f32 %v808_v0, %v229_v28  ;;  %v873_v31 = vmax.f32 %v810_v1, %v230_v29  ;;  %v556_v25 = vpack.c.bf16 %v353_v22, %v351_v21  ;;  %555 = vmatprep.subr.bf16.mxu1 %v554_v20  ;;  %v357_v28 = vld [vmem:[#allocation7 + $0x110] sm:$0xff]  ;;  %v360_v29 = vld [vmem:[#allocation7 + $0x128] sm:$0xff]  ;;  %v375_v17 = vld [vmem:[#allocation7 + $0x1a0] sm:$0xff] }
 0x1b2   :  { %v560_v33 = vpack.c.bf16 %v357_v28, %v355_v27  ;;  %v562_v34 = vpack.c.bf16 %v362_v32, %v360_v29  ;;  %v377_v20 = vld [vmem:[#allocation7 + $0x1b0] sm:$0xff] }
 0x1b3   :  { %237 = vrot.lane.b32.xlu0 %v870_v30, %s725_s2  ;;  %241 = vrot.lane.b32.xlu1 %v873_v31, %s725_s2  ;;  %v580_v23 = vpack.c.bf16 %v377_v20, %v375_v17  ;;  %v381_v27 = vld [vmem:[#allocation7 + $0x1d0] sm:$0xff] }
 0x1b4   :  { %557 = vmatpush1.bf16.msra.mxu1 %v556_v25  ;;  %v382_v25 = vld [vmem:[#allocation7 + $0x1d8] sm:$0xff] }
 0x1b5   :  { %559 = vmatprep.subr.bf16.mxu1 %v558_v26  ;;  %v379_v26 = vld [vmem:[#allocation7 + $0x1c0] sm:$0xff] }
 0x1b6   :  { %v584_v32 = vpack.c.bf16 %v381_v27, %v379_v26 }
 0x1b7   :  { %250 = vrot.lane.b32.xlu0 %v870_v30, %s726_s6  ;;  %254 = vrot.lane.b32.xlu1 %v873_v31, %s726_s6 }
 0x1b8   :  { %561 = vmatpush1.bf16.msra.mxu1 %v560_v33 }
 0x1b9   :  { %563 = vmatprep.subr.bf16.mxu1 %v562_v34 }
 0x1bc   :  { %565 = vmatpush1.bf16.msra.mxu1 %v564_v37 }
 0x1bd   :  { %567 = vmatprep.subr.bf16.mxu1 %v566_v40 }
 0x1c0   :  { %569 = vmatpush1.bf16.msra.mxu1 %v568_v43  ;;  %v383_v43 = vld [vmem:[#allocation7 + $0x1e0] sm:$0xff] }
 0x1c1   :  { %571 = vmatprep.subr.bf16.mxu1 %v570_v48  ;;  %v588_v45 = vpack.c.bf16 %v385_v44, %v383_v43 }
 0x1c4   :  { %573 = vmatpush1.bf16.msra.mxu1 %v572_v53 }
 0x1c5   :  { %575 = vmatprep.subr.bf16.mxu1 %v574_v59 }
 0x1c8   :  { %577 = vmatpush1.bf16.msra.mxu1 %v576_v5 }
 0x1c9   :  { %579 = vmatprep.subr.bf16.mxu1 %v578_v16 }
 0x1cc   :  { %581 = vmatpush1.bf16.msra.mxu1 %v580_v23 }
 0x21d   :  { %v240_v51 = vpop.permute.xlu1 %239  ;;  %v236_v52 = vpop.permute.xlu0 %235 }
 0x21e   :  { %v244_v6 = vsel %vm243_vm4, %v236_v52, %v240_v51  ;;  %v246_v7 = vsel %vm243_vm4, %v240_v51, %v236_v52 }
 0x221   :  { %v253_v63 = vpop.permute.xlu1 %252  ;;  %v249_v4 = vpop.permute.xlu0 %248 }
 0x222   :  { %v257_v8 = vsel %vm256_vm5, %v249_v4, %v253_v63  ;;  %v259_v9 = vsel %vm256_vm5, %v253_v63, %v249_v4 }
 0x223   :  { %v265_v10 = vsel %vm883_vm6, %v244_v6, %v259_v9  ;;  %v266_v11 = vsel %vm887_vm7, %v246_v7, %v257_v8 }
 0x224   :  { %v904_v14 = vmax.f32 %v851_v19, %v265_v10  ;;  %v270_v15 = vmax.f32 %v848_v18, %v266_v11  ;;  %v582_v19 = vpack.c.bf16 %v382_v25, %v380_v24 }
 0x225   :  { %v242_v21 = vpop.permute.xlu1 %241  ;;  %v238_v22 = vpop.permute.xlu0 %237 }
 0x226   :  { %273 = vrot.lane.b32.xlu0 %v904_v14, %s727_s7  ;;  %277 = vrot.lane.b32.xlu1 %v270_v15, %s727_s7  ;;  %v245_v18 = vsel %vm243_vm4, %v238_v22, %v242_v21  ;;  %v247_v33 = vsel %vm243_vm4, %v242_v21, %v238_v22 }
 0x227   :  { %583 = vmatprep.subr.bf16.mxu1 %v582_v19 }
 0x228   :  { %585 = vmatpush1.bf16.msra.mxu1 %v584_v32 }
 0x229   :  { %v255_v28 = vpop.permute.xlu1 %254  ;;  %v251_v29 = vpop.permute.xlu0 %250  ;;  %587 = vmatprep.subr.bf16.mxu1 %v586_v42 }
 0x22a   :  { %v258_v34 = vsel %vm256_vm5, %v251_v29, %v255_v28  ;;  %v260_v35 = vsel %vm256_vm5, %v255_v28, %v251_v29  ;;  %286 = vrot.lane.b32.xlu0 %v904_v14, %s728_s8  ;;  %290 = vrot.lane.b32.xlu1 %v270_v15, %s728_s8 }
 0x22b   :  { %v267_v36 = vsel %vm883_vm6, %v245_v18, %v260_v35  ;;  %v268_v37 = vsel %vm887_vm7, %v247_v33, %v258_v34 }
 0x22c   :  { %v271_v40 = vmax.f32 %v870_v30, %v267_v36  ;;  %v272_v41 = vmax.f32 %v873_v31, %v268_v37  ;;  %589 = vmatpush1.bf16.msra.mxu1 %v588_v45 }
 0x22e   :  { %275 = vrot.lane.b32.xlu0 %v271_v40, %s727_s7  ;;  %279 = vrot.lane.b32.xlu1 %v272_v41, %s727_s7 }
 0x232   :  { %288 = vrot.lane.b32.xlu0 %v271_v40, %s728_s8  ;;  %292 = vrot.lane.b32.xlu1 %v272_v41, %s728_s8 }
 0x298   :  { %v278_v30 = vpop.permute.xlu1 %277  ;;  %v274_v48 = vpop.permute.xlu0 %273 }
 0x299   :  { %v282_v52 = vsel %vm281_vm8, %v274_v48, %v278_v30  ;;  %v284_v3 = vsel %vm281_vm8, %v278_v30, %v274_v48 }
 0x29c   :  { %v291_v50 = vpop.permute.xlu1 %290  ;;  %v287_v51 = vpop.permute.xlu0 %286 }
 0x29d   :  { %v295_v53 = vsel %vm294_vm9, %v287_v51, %v291_v50  ;;  %v297_v54 = vsel %vm294_vm9, %v291_v50, %v287_v51 }
 0x29e   :  { %v303_v55 = vsel %vm931_vm10, %v282_v52, %v297_v54  ;;  %v304_v56 = vsel %vm935_vm11, %v284_v3, %v295_v53 }
 0x29f   :  { %v307_v57 = vmax.f32 %v904_v14, %v303_v55  ;;  %v308_v59 = vmax.f32 %v270_v15, %v304_v56 }
 0x2a0   :  { %v280_v60 = vpop.permute.xlu1 %279  ;;  %v276_v61 = vpop.permute.xlu0 %275 }
 0x2a1   :  { %v311_v63 = vsub.f32 %v802_v58, %v307_v57  ;;  %v312_v4 = vsub.f32 %v806_v62, %v308_v59  ;;  %v283_v7 = vsel %vm281_vm8, %v276_v61, %v280_v60  ;;  %v285_v10 = vsel %vm281_vm8, %v280_v60, %v276_v61 }
 0x2a3   :  { %v315_v5 = vmul.f32 1.442695, %v311_v63  ;;  %v317_v6 = vmul.f32 1.442695, %v312_v4 }
 0x2a4   :  { %v293_v8 = vpop.permute.xlu1 %292  ;;  %v289_v9 = vpop.permute.xlu0 %288 }
 0x2a5   :  { %605 = vpow2.f32 %v315_v5  ;;  %v296_v11 = vsel %vm294_vm9, %v289_v9, %v293_v8  ;;  %v298_v12 = vsel %vm294_vm9, %v293_v8, %v289_v9 }
 0x2a6   :  { %607 = vpow2.f32 %v317_v6  ;;  %v305_v58 = vsel %vm931_vm10, %v283_v7, %v298_v12  ;;  %v306_v62 = vsel %vm935_vm11, %v285_v10, %v296_v11 }
 0x2a7   :  { %v309_v13 = vmax.f32 %v271_v40, %v305_v58  ;;  %v310_v14 = vmax.f32 %v272_v41, %v306_v62 }
 0x2a9   :  { %v313_v15 = vsub.f32 %v808_v0, %v309_v13  ;;  %v314_v16 = vsub.f32 %v810_v1, %v310_v14 }
 0x2ab   :  { %v319_v17 = vmul.f32 1.442695, %v313_v15  ;;  %v321_v20 = vmul.f32 1.442695, %v314_v16 }
 0x2ad   :  { %609 = vpow2.f32 %v319_v17 }
 0x2ae   :  { %611 = vpow2.f32 %v321_v20 }
 0x2af   :  { %v606_v21 = vpop.eup %605 }
 0x2b0   :  { %v608_v2 = vpop.eup %607 }
 0x2b1   :  { %451 = vmatprep.mubr.f32.mxu1 %v608_v2 }
 0x2b2   :  { %452 = vmatmul.mubr.f32.vlgmr.msra.gmra.mrb[0].mxu1 %v606_v21 }
 0x2b7   :  { %v610_v22 = vpop.eup %609 }
 0x2b8   :  { %v612_v23 = vpop.eup %611 }
 0x2b9   :  { %457 = vmatprep.mubr.f32.mxu1 %v612_v23 }
 0x2ba   :  { %458 = vmatmul.mubr.f32.gmra.mrb[2].mxu1 %v610_v22 }
 0x385   :  { %v453_v24 = vpop.f32.mrb[0].mxu1 }
 0x386   :  { %613 = vrcp.f32 %v453_v24  ;;  %v455_v25 = vpop.f32.mrb[1].mxu1 }
 0x387   :  { %615 = vrcp.f32 %v455_v25 }
 0x38d   :  { %v459_v19 = vpop.f32.mrb[2].mxu1 }
 0x38e   :  { %617 = vrcp.f32 %v459_v19  ;;  %v461_v0 = vpop.f32.mrb[3].mxu1 }
 0x38f   :  { %619 = vrcp.f32 %v461_v0 }
 0x390   :  { %v614_v1 = vpop.eup %613 }
 0x391   :  { %v616_v26 = vpop.eup %615  ;;  %v468_v27 = vmul.f32 %v614_v1, %v606_v21 }
 0x392   :  { %v469_v18 = vmul.f32 %v616_v26, %v608_v2 }
 0x393   :  { %472 = vst [vmem:[#allocation8] sm:$0xff] %v468_v27 }
 0x394   :  { %473 = vst [vmem:[#allocation8 + $0x8] sm:$0xff] %v469_v18 }
 0x398   :  { %v618_v28 = vpop.eup %617 }
 0x399   :  { %v620_v29 = vpop.eup %619  ;;  %v470_v32 = vmul.f32 %v618_v28, %v610_v22 }
 0x39a   :  { %v471_v33 = vmul.f32 %v620_v29, %v612_v23 }
 0x39b   :  { %474 = vst [vmem:[#allocation8 + $0x10] sm:$0xff] %v470_v32 }
 0x39c   :  { %475 = vst [vmem:[#allocation8 + $0x18] sm:$0xff] %v471_v33 }
 0x39d   :  { %698 = shalt.err (!%p695_p0)
}
 0x39e   :  { %s699_s13 = scalar_lea.hbm %s987_s4, 512 }
 0x39f   :  { %p700_p1 = scmp.ne.s32.totalorder %s987_s4, %s699_s13  ;;  %p703_p2 = scmp.lt.u32.totalorder %s699_s13, %s987_s4 }
 0x3a1   :  { %p705_p3 = pnand %p703_p2, %p700_p1 }
 0x3a3   :  { %708 = shalt.err (!%p705_p3)
}
 0x3a4   :  { %487 = dma.vmem_to_hbm [thread:$0]  %s482_s10, 512, %s987_s4, [#allocation4], %s716_s25, %s716_s25, %s717_s26  }
 0x3a5   :  { %713 = dma.done.wait [#allocation4], 512  }
 0x3a6   :  { %714 = vsyncadd [#allocation4], 4294966784 }
 0x3a7   :  { %491 = vsyncpa [#allocation3], 1 }
 0x3a8   :  { %492 = vsyncpa [#allocation6], 1 }
 0x3a9   :  { %493 = vsyncpa [#allocation4], 1 }

</bundles_post_ra>
